<compile_context>
chip_gen: v7x
topology: tpu7x:2x2x1
jax: 0.10.0
libtpu: 0.0.40
codegen_flags: <defaults>
</compile_context>

<pallas_src>
import jax
import jax.numpy as jnp
from jax.experimental import pallas as pl
from jax.experimental.pallas import tpu as pltpu

_LANES = 128


def _snake_kernel(x_ref, alpha_ref, o_ref):
    # x_ref/o_ref: (r_tile, t_tile) in the I/O dtype; alpha_ref: (r_tile, 1) f32.
    x = x_ref[...].astype(jnp.float32)          # no-op for f32 I/O
    alpha = alpha_ref[...]                      # f32, one value per row
    inv_alpha = 1.0 / (alpha + 1e-9)            # exact; r_tile values only
    s = jnp.sin(alpha * x)
    o_ref[...] = (x + inv_alpha * (s * s)).astype(o_ref.dtype)


def snake1d(x: jax.Array, alpha: jax.Array, *, max_tile_bytes: int = 6 << 20) -> jax.Array:
    """x: (B, C, T), alpha: (1, C, 1) -> (B, C, T). Elementwise snake activation."""
    B, C, T = x.shape
    assert alpha.shape == (1, C, 1), (alpha.shape, C)

    R = B * C
    itemsize = jnp.dtype(x.dtype).itemsize
    sub = max(8, 32 // itemsize)                # sublane quantum: 8 f32, 16 bf16, 32 i8

    # Free layout plumbing: merge (B, C) -> rows; one f32 alpha per row (tiny).
    x2 = x.reshape(R, T)
    alpha_rows = jnp.broadcast_to(
        alpha.astype(jnp.float32).reshape(1, C), (B, C)).reshape(R, 1)

    r_full = pl.cdiv(R, sub) * sub
    t_full = pl.cdiv(T, _LANES) * _LANES

    # Tile budget in f32-equivalent elements: with the in-kernel f32 upcast the
    # dominant temporaries are f32 regardless of the I/O dtype.
    budget_elems = max(sub * _LANES, max_tile_bytes // 4)
    # Lane axis first (lane-dense stores), spend the remainder on rows.
    t_tile = min(t_full, max(_LANES, (budget_elems // sub) // _LANES * _LANES))
    r_tile = min(r_full, max(sub, (budget_elems // t_tile) // sub * sub))

    n_r, n_t = pl.cdiv(R, r_tile), pl.cdiv(T, t_tile)
    # v7x has 2 TensorCores: make sure a "parallel" axis has >= 2 steps to shard
    # whenever the problem is big enough to split.
    if n_r * n_t == 1:
        if t_tile > _LANES:
            t_tile = pl.cdiv(pl.cdiv(T, 2), _LANES) * _LANES
        elif r_tile > sub:
            r_tile = pl.cdiv(pl.cdiv(R, 2), sub) * sub
        n_r, n_t = pl.cdiv(R, r_tile), pl.cdiv(T, t_tile)

    # Scoped-VMEM budget derived from the actual tile: 2 in + 2 out I/O buffers
    # plus headroom for the f32 elementwise temporaries.  Stays well under
    # v7x's 64 MiB physical VMEM while lifting v5e's 16 MiB default.
    tile_bytes = r_tile * t_tile * itemsize
    vmem_limit = int(min(56 << 20, 4 * tile_bytes + (20 << 20)))

    out2 = pl.pallas_call(
        _snake_kernel,
        out_shape=jax.ShapeDtypeStruct((R, T), x.dtype),
        grid=(n_r, n_t),
        in_specs=[
            pl.BlockSpec((r_tile, t_tile), lambda r, t: (r, t)),
            pl.BlockSpec((r_tile, 1), lambda r, t: (r, 0)),
        ],
        out_specs=pl.BlockSpec((r_tile, t_tile), lambda r, t: (r, t)),
        compiler_params=pltpu.CompilerParams(
            dimension_semantics=("parallel", "parallel"),
            vmem_limit_bytes=vmem_limit,
        ),
    )(x2, alpha_rows)

    return out2.reshape(B, C, T)                 # free un-merge


def snake1d_ref(x, alpha):
    # Pure-JAX (f32) reference matching the torch.jit.script semantics.
    xf = x.astype(jnp.float32)
    af = alpha.astype(jnp.float32)
    return xf + (1.0 / (af + 1e-9)) * jnp.sin(af * xf) ** 2


if __name__ == "__main__":
    key = jax.random.PRNGKey(0)
    kx, ka, kx2, ka2, kx3, ka3 = jax.random.split(key, 6)

    # 1) Small shapes consistent with the module (B, C, T): single-block path.
    B, C, T = 2, 4, 16
    x = jax.random.normal(kx, (B, C, T), dtype=jnp.float32)
    alpha = jnp.ones((1, C, 1), jnp.float32) + 0.1 * jax.random.normal(ka, (1, C, 1), jnp.float32)
    y = snake1d(x, alpha)
    jax.block_until_ready(y)
    assert y.shape == (B, C, T)
    assert jnp.allclose(y, snake1d_ref(x, alpha), atol=1e-5, rtol=1e-5), "mismatch (small)"

    # 2) Ragged T (300 = 2*128 + 44) with a forced-tiny tile budget: exercises
    #    the multi-tile grid and the masked partial last T block (no padding).
    B2, C2, T2 = 2, 8, 300
    x2 = jax.random.normal(kx2, (B2, C2, T2), dtype=jnp.float32)
    alpha2 = jnp.ones((1, C2, 1), jnp.float32) + 0.1 * jax.random.normal(ka2, (1, C2, 1), jnp.float32)
    y2 = snake1d(x2, alpha2, max_tile_bytes=8 * _LANES * 4)   # -> (8,128) blocks, grid (2,3)
    jax.block_until_ready(y2)
    assert y2.shape == (B2, C2, T2)
    assert jnp.allclose(y2, snake1d_ref(x2, alpha2), atol=1e-5, rtol=1e-5), "mismatch (ragged T)"

    # 3) Ragged rows AND lanes (R = 15 not a multiple of 8, T = 200) with the
    #    default budget: exercises masked partial blocks on both block dims and
    #    the >=2-grid-step split.
    B3, C3, T3 = 3, 5, 200
    x3 = jax.random.normal(kx3, (B3, C3, T3), dtype=jnp.float32)
    alpha3 = jnp.ones((1, C3, 1), jnp.float32) + 0.1 * jax.random.normal(ka3, (1, C3, 1), jnp.float32)
    y3 = snake1d(x3, alpha3)
    jax.block_until_ready(y3)
    assert y3.shape == (B3, C3, T3)
    assert jnp.allclose(y3, snake1d_ref(x3, alpha3), atol=1e-5, rtol=1e-5), "mismatch (ragged R/T)"

    # 4) bf16 I/O path: half HBM traffic, f32 math inside; compare against the
    #    f32 reference with bf16-rounding tolerance.
    xb = x2.astype(jnp.bfloat16)
    yb = snake1d(xb, alpha2)
    jax.block_until_ready(yb)
    assert yb.dtype == jnp.bfloat16 and yb.shape == (B2, C2, T2)
    assert jnp.allclose(yb.astype(jnp.float32), snake1d_ref(xb, alpha2),
                        atol=2e-2, rtol=2e-2), "mismatch (bf16)"

    print("KERNEL_OK")
</pallas_src>

<mosaic_0001>
module attributes {stable_mosaic.version = 11 : i64} {
  func.func @_snake_kernel(%arg0: i32, %arg1: i32, %arg2: memref<8x128xf32, #tpu.memory_space<vmem>>, %arg3: memref<8x1xf32, #tpu.memory_space<vmem>>, %arg4: memref<8x128xf32, #tpu.memory_space<vmem>>) attributes {dimension_semantics = [#tpu.dimension_semantics<parallel>, #tpu.dimension_semantics<parallel>], iteration_bounds = array<i64: 1, 1>, scalar_prefetch = 0 : i64, scratch_operands = 0 : i64, tpu.core_type = #tpu.core_type<tc>, window_params = [{transform_indices = @transform_0, window_bounds = array<i64: 8, 128>}, {transform_indices = @transform_1, window_bounds = array<i64: 8, 1>}, {transform_indices = @transform_2, window_bounds = array<i64: 8, 128>}]} {
    %c0 = arith.constant 0 : index
    %c0_0 = arith.constant 0 : index
    %0 = vector.load %arg2[%c0, %c0_0] : memref<8x128xf32, #tpu.memory_space<vmem>>, vector<8x128xf32>
    %c0_1 = arith.constant 0 : index
    %c0_2 = arith.constant 0 : index
    %1 = vector.load %arg3[%c0_1, %c0_2] : memref<8x1xf32, #tpu.memory_space<vmem>>, vector<8x1xf32>
    %cst = arith.constant 9.99999971E-10 : f32
    %2 = vector.broadcast %cst : f32 to vector<8x1xf32>
    %3 = arith.addf %1, %2 : vector<8x1xf32>
    %cst_3 = arith.constant 1.000000e+00 : f32
    %4 = vector.broadcast %cst_3 : f32 to vector<8x1xf32>
    %5 = arith.divf %4, %3 : vector<8x1xf32>
    %6 = vector.broadcast %1 : vector<8x1xf32> to vector<8x128xf32>
    %7 = arith.mulf %6, %0 : vector<8x128xf32>
    %8 = math.sin %7 : vector<8x128xf32>
    %9 = arith.mulf %8, %8 : vector<8x128xf32>
    %10 = vector.broadcast %5 : vector<8x1xf32> to vector<8x128xf32>
    %11 = arith.mulf %10, %9 : vector<8x128xf32>
    %12 = arith.addf %0, %11 : vector<8x128xf32>
    %c0_4 = arith.constant 0 : index
    %c0_5 = arith.constant 0 : index
    %13 = vector.load %arg4[%c0_4, %c0_5] : memref<8x128xf32, #tpu.memory_space<vmem>>, vector<8x128xf32>
    tpu.vector_store %arg4[%c0_4, %c0_5], %12 {strides = array<i32>} : memref<8x128xf32, #tpu.memory_space<vmem>>, vector<8x128xf32>,
    return
  }
  func.func @transform_0(%arg0: i32, %arg1: i32) -> (i32, i32) {
    %c0_i32 = arith.constant 0 : i32
    return %arg0, %arg1 : i32, i32
  }
  func.func @transform_1(%arg0: i32, %arg1: i32) -> (i32, i32) {
    %c0_i32 = arith.constant 0 : i32
    %c0_i32_0 = arith.constant 0 : i32
    return %arg0, %c0_i32 : i32, i32
  }
  func.func @transform_2(%arg0: i32, %arg1: i32) -> (i32, i32) {
    %c0_i32 = arith.constant 0 : i32
    return %arg0, %arg1 : i32, i32
  }
}

</mosaic_0001>

<bundles_post_ra>
// kernel: tpu_custom_call.1
= control target key start
LH: loop header
LB: loop body
LE: loop exit
PB: predicated region body
PF: predicated region fallthrough
CT: control target
= control target key end

     0   :  { %v197_v1 = vmov 0   ;;  %s263_s0 = inlined_call_operand.vmem [shape: f32[8,16], index: 0, kind: input, shape index: {}]   ;;  %s264_s1 = inlined_call_operand.vmem [shape: f32[8,1], index: 1, kind: input, shape index: {}]   ;;  %s265_s2 = inlined_call_operand.hbm [shape: f32[8,16], index: 2, kind: output, shape index: {}]  }
   0x1   :  { %v13_v0 = vld [vmem:[%s264_s1] sm:$0xff]  ;;  %166 = vset.pattern.permute.xlu0 %v197_v1 }
   0x2   :  { %v14_v2 = vadd.f32 1e-09, %v13_v0  ;;  %19 = vperm.xlu0 %166, %v13_v0  }
   0x4   :  { %167 = vrcp.f32 %v14_v2 }
   0x5   :  { %7 = vsyncpa [#allocation3], 0  ;;  %v226_v4 = vld [vmem:[%s263_s0] sm:$0xff]  ;;  %v198_v17 = vmov 683565275   ;;  %s204_s0 = smov [#allocation2]  }
   0x6   :  { %v199_v19 = vmov 2475754826   ;;  %v200_v22 = vmov 2131351028   ;;  %v201_v25 = vmov 2102212464  }
   0x7   :  { %v202_v28 = vmov 920167782   ;;  %v203_v31 = vmov 1326507024   ;;  %s142_s1 = sshll.u32 %s204_s0, 4  ;;  %s143_s1 = int_to_ptr.vmem [resolvable:$true] %s142_s1 }
   0x8   :  { %s173_s13 = scalar_lea.vmem %s143_s1, 128  ;;  %p178_p1 = scmp.lt.s32.totalorder %s143_s1, %s143_s1 }
   0x9   :  { %p174_p0 = scmp.ne.s32.totalorder %s143_s1, %s173_s13  ;;  %p179_p2 = scmp.lt.s32.totalorder %s173_s13, %s173_s13 }
   0xb   :  { %p180_p3 = por %p179_p2, %p178_p1 }
   0xd   :  { %p181_p4 = pnand %p180_p3, %p174_p0 }
   0xe   :  { %v168_v3 = vpop.eup %167 }
   0xf   :  { %130 = vperm.xlu0 %166, %v168_v3  }
  0x81   :  { %v20_v5 = vpop.permute.xlu0 %19 }
  0x82   :  { %v229_v6 = vmul.f32 %v20_v5, %v226_v4 }
  0x84   :  { %v26_v7 = vand.u32 2139095040, %v229_v6  ;;  %v23_v11 = vand.u32 2147483647, %v229_v6  ;;  %vm25_vm7 = vcmp.lt.s32.totalorder %v229_v6, 0  ;;  %vm115_vm12 = vweird.f32 %v229_v6 }
  0x86   :  { %v27_v8 = vshrl.u32 %v26_v7, 23  ;;  %v30_v14 = vand.u32 8388607, %v23_v11  ;;  %vm24_vm8 = vcmp.le.f32.partialorder %v23_v11, 0.7853982 }
  0x88   :  { %v150_v9 = vadd.s32 4294967169, %v27_v8  ;;  %v31_v33 = vor.u32 8388608, %v30_v14 }
  0x8a   :  { %v33_v10 = vadd.s32 1, %v150_v9  ;;  %v71_v47 = vshll.u32 %v31_v33, 8 }
  0x8c   :  { %vm34_vm0 = vcmp.gt.s32.totalorder %v33_v10, 0 }
  0x8d   :  { %v35_v12 = vsel %vm34_vm0, %v33_v10, 0 }
  0x8e   :  { %v37_v13 = vand.u32 31, %v35_v12  ;;  %v36_v16 = vshrl.u32 %v35_v12, 5 }
  0x90   :  { %v38_v15 = vsub.s32 32, %v37_v13  ;;  %v40_v18 = vshll.u32 %v198_v17, %v37_v13  ;;  %v43_v20 = vshll.u32 %v199_v19, %v37_v13  ;;  %v46_v24 = vshll.u32 %v200_v22, %v37_v13 }
  0x91   :  { %v49_v27 = vshll.u32 %v201_v25, %v37_v13  ;;  %v52_v30 = vshll.u32 %v202_v28, %v37_v13  ;;  %vm55_vm1 = vcmp.lt.s32.totalorder %v36_v16, 1  ;;  %vm58_vm2 = vcmp.lt.s32.totalorder %v36_v16, 4 }
  0x92   :  { %v41_v21 = vshrl.u32 %v199_v19, %v38_v15  ;;  %v44_v23 = vshrl.u32 %v200_v22, %v38_v15  ;;  %v47_v26 = vshrl.u32 %v201_v25, %v38_v15  ;;  %v50_v29 = vshrl.u32 %v202_v28, %v38_v15 }
  0x93   :  { %v53_v32 = vshrl.u32 %v203_v31, %v38_v15  ;;  %v39_v42 = vshrl.u32 %v198_v17, %v38_v15  ;;  %vm57_vm3 = vcmp.lt.s32.totalorder %v36_v16, 3  ;;  %vm56_vm4 = vcmp.lt.s32.totalorder %v36_v16, 2 }
  0x94   :  { %v42_v34 = vor.u32 %v41_v21, %v40_v18  ;;  %v45_v35 = vor.u32 %v44_v23, %v43_v20  ;;  %v48_v36 = vor.u32 %v47_v26, %v46_v24  ;;  %v51_v37 = vor.u32 %v50_v29, %v49_v27 }
  0x95   :  { %v54_v38 = vor.u32 %v53_v32, %v52_v30 }
  0x96   :  { %v60_v39 = vsel %vm58_vm2, %v48_v36, 2102212464  ;;  %v63_v40 = vsel %vm55_vm1, %v42_v34, %v45_v35  ;;  %v67_v41 = vsel %vm55_vm1, %v45_v35, %v48_v36  ;;  %v64_v43 = vsel %vm58_vm2, %v51_v37, 920167782 }
  0x97   :  { %v68_v44 = vsel %vm58_vm2, %v54_v38, 1326507024  ;;  %v65_v45 = vsel %vm57_vm3, %v48_v36, %v64_v43  ;;  %v59_v48 = vsel %vm55_vm1, %v39_v42, %v42_v34  ;;  %v61_v49 = vsel %vm57_vm3, %v45_v35, %v60_v39 }
  0x98   :  { %v69_v46 = vsel %vm57_vm3, %v51_v37, %v68_v44  ;;  %v66_v50 = vsel %vm56_vm4, %v63_v40, %v65_v45  ;;  %v62_v56 = vsel %vm56_vm4, %v59_v48, %v61_v49  ;;  %v131_v37 = vpop.permute.xlu0 %130 }
  0x99   :  { %v70_v51 = vsel %vm56_vm4, %v67_v41, %v69_v46  ;;  %v238_v54 = vmul.u32.u64.low %v71_v47, %v66_v50  ;;  %v239_v55 = vmul.u32.u64.high %v71_v47, %v66_v50, %v238_v54  ;;  %v78_v58 = vmul.u32 %v71_v47, %v62_v56 }
  0x9a   :  { %v235_v52 = vmul.u32.u64.low %v71_v47, %v70_v51  ;;  %v236_v53 = vmul.u32.u64.high %v71_v47, %v70_v51, %v235_v52 }
  0x9b   :  { %v81_v57 = vadd.s32 1, %v239_v55 }
  0x9c   :  { %vm80_vm5 = vc.u32 %v236_v53, %v238_v54  ;;  %v79_v8 = vadd.s32 %v238_v54, %v236_v53 }
  0x9d   :  { %v82_v59 = vsel %vm80_vm5, %v81_v57, %v239_v55 }
  0x9e   :  { %v83_v60 = vadd.s32 %v82_v59, %v78_v58 }
  0xa0   :  { %v84_v61 = vadd.s32 536870912, %v83_v60 }
  0xa2   :  { %v85_v62 = vshrl.u32 %v84_v61, 30 }
  0xa4   :  { %v86_v63 = vshll.u32 %v85_v62, 30  ;;  %v109_v21 = vsub.s32 4, %v85_v62 }
  0xa6   :  { %v87_v0 = vsub.s32 %v83_v60, %v86_v63  ;;  %v110_v24 = vsel %vm25_vm7, %v109_v21, %v85_v62 }
  0xa7   :  { %v112_v26 = vsel %vm24_vm8, 0, %v110_v24 }
  0xa8   :  { %v89_v1 = vsub.s32 0, %v87_v0  ;;  %v116_v27 = vadd.s32 3, %v112_v26 }
  0xaa   :  { %v151_v2 = vmin.u32 %v89_v1, %v87_v0  ;;  %v117_v28 = vand.u32 3, %v116_v27 }
  0xac   :  { %v91_v3 = vclz %v151_v2  ;;  %vm122_vm9 = vcmp.eq.s32.totalorder %v117_v28, 2  ;;  %vm119_vm10 = vcmp.eq.s32.totalorder %v117_v28, 0  ;;  %vm118_vm11 = vcmp.lt.s32.totalorder %v117_v28, 2 }
  0xae   :  { %v152_v5 = vadd.s32 4294967294, %v91_v3 }
  0xb0   :  { %vm153_vm6 = vcmp.lt.s32.totalorder %v152_v5, 0 }
  0xb1   :  { %v94_v7 = vsel %vm153_vm6, 0, %v152_v5 }
  0xb2   :  { %v95_v9 = vsub.s32 32, %v94_v7  ;;  %v99_v10 = vsub.s32 4294967266, %v94_v7  ;;  %v96_v12 = vshll.u32 %v87_v0, %v94_v7 }
  0xb4   :  { %v97_v13 = vshrl.u32 %v79_v8, %v95_v9  ;;  %v100_v14 = vadd.s32 127, %v99_v10 }
  0xb6   :  { %v98_v15 = vor.u32 %v97_v13, %v96_v12  ;;  %v101_v16 = vshll.u32 %v100_v14, 23 }
  0xb8   :  { %v102_v17 = vor.u32 4788187, %v101_v16  ;;  %v105_v19 = vcvt.s32.f32 %v98_v15 }
  0xba   :  { %v103_v18 = vand.u32 2147483647, %v102_v17 }
  0xbc   :  { %v106_v20 = vmul.f32 %v105_v19, %v103_v18 }
  0xbe   :  { %v107_v22 = vxor.u32 2147483648, %v106_v20 }
  0xc0   :  { %v108_v23 = vsel %vm25_vm7, %v107_v22, %v106_v20 }
  0xc1   :  { %v111_v25 = vsel %vm24_vm8, %v229_v6, %v108_v23 }
  0xc2   :  { %169 = vcosq.f32 %v111_v25 }
  0xc3   :  { %171 = vsinq.f32 %v111_v25 }
  0xcc   :  { %v170_v29 = vpop.eup %169 }
  0xcd   :  { %v172_v30 = vpop.eup %171  ;;  %v123_v31 = vxor.u32 2147483648, %v170_v29 }
  0xce   :  { %v120_v32 = vxor.u32 2147483648, %v172_v30 }
  0xcf   :  { %v124_v33 = vsel %vm122_vm9, %v123_v31, %v172_v30 }
  0xd0   :  { %v121_v34 = vsel %vm119_vm10, %v170_v29, %v120_v32 }
  0xd1   :  { %v125_v11 = vsel %vm118_vm11, %v121_v34, %v124_v33 }
  0xd2   :  { %v126_v35 = vsel %vm115_vm12, nan, %v125_v11 }
  0xd3   :  { %v127_v36 = vmul.f32 %v126_v35, %v126_v35 }
  0xd5   :  { %v133_v38 = vmul.f32 %v131_v37, %v127_v36 }
  0xd7   :  { %v134_v39 = vadd.f32 %v133_v38, %v226_v4 }
  0xd9   :  { %135 = vst [vmem:[#allocation2] sm:$0xff] %v134_v39 }
  0xda   :  { %184 = shalt.err (!%p181_p4)
}
  0xdb   :  { %s185_s16 = scalar_lea.hbm %s265_s2, 128 }
  0xdc   :  { %p186_p5 = scmp.ne.s32.totalorder %s265_s2, %s185_s16  ;;  %p189_p6 = scmp.lt.u32.totalorder %s185_s16, %s265_s2 }
  0xde   :  { %p191_p7 = pnand %p189_p6, %p186_p5 }
  0xe0   :  { %194 = shalt.err (!%p191_p7)
}
  0xe1   :  { %145 = dma.vmem_to_hbm [thread:$0]  %s143_s1, 128, %s265_s2, [#allocation3]  }
  0xe2   :  { %195 = dma.done.wait [#allocation3], 128  }
  0xe3   :  { %196 = vsyncadd [#allocation3], 4294967168 }
  0xe4   :  { %149 = vsyncpa [#allocation3], 1 }

</bundles_post_ra>
